<compile_context>
chip_gen: v7x
topology: tpu7x:2x2x1
jax: 0.10.0
libtpu: 0.0.40
codegen_flags: <defaults>
</compile_context>

<pallas_src>
import functools

import jax
import jax.numpy as jnp
from jax.experimental import pallas as pl
from jax.experimental.pallas import tpu as pltpu

EPS = 1e-5
LANE = 128
VMEM_BUDGET = 36 * 1024 * 1024   # per-call working-set target (safe on v7x's 64 MiB)
VMEM_LIMIT = 48 * 1024 * 1024    # scoped VMEM limit (v5e default is only 16 MiB)


def _round_up(x, m):
    return (x + m - 1) // m * m


# ----------------------------------------------------------------------------
# Pass 1: per-channel sum / sum-of-squares of g = x @ w1 over the batch.
# Grid = (NC, NT_PER): the leading "parallel" axis splits the batch tiles
# across TensorCores (2x on v7x); the inner "arbitrary" axis accumulates into
# a resident (1, HP) block per core.  Zero-padded batch rows give g == 0 rows
# and contribute nothing, so no row mask is needed.
# ----------------------------------------------------------------------------
def _stats_kernel(x_ref, w1_ref, sum_ref, sq_ref):
    @pl.when(pl.program_id(1) == 0)
    def _():
        sum_ref[...] = jnp.zeros_like(sum_ref)
        sq_ref[...] = jnp.zeros_like(sq_ref)

    g = jnp.dot(x_ref[...], w1_ref[...], preferred_element_type=jnp.float32)
    sum_ref[...] += jnp.sum(g, axis=0, keepdims=True)
    sq_ref[...] += jnp.sum(g * g, axis=0, keepdims=True)


# ----------------------------------------------------------------------------
# Pass 2: o = relu((x @ w1) * scale + shift) @ w2 + b2
# BN (b1, gamma, beta, mean, var) is pre-folded into scale/shift.
# ----------------------------------------------------------------------------
def _fwd_kernel(x_ref, w1_ref, scale_ref, shift_ref, w2_ref, b2_ref, o_ref):
    g = jnp.dot(x_ref[...], w1_ref[...], preferred_element_type=jnp.float32)
    h = jnp.maximum(g * scale_ref[...] + shift_ref[...], 0.0)
    o = jnp.dot(h.astype(w2_ref.dtype), w2_ref[...],
                preferred_element_type=jnp.float32) + b2_ref[...]
    o_ref[...] = o.astype(o_ref.dtype)


def _pick_batch_tile(B, F, OP, x_bytes, out_bytes, hp):
    """Largest batch tile whose double-buffered working set fits the budget."""
    fixed = F * hp * x_bytes + hp * OP * x_bytes + 4 * (2 * hp + OP)  # resident
    avail = max(VMEM_BUDGET - fixed, 1 << 20)
    per_row = 2 * F * x_bytes + 2 * OP * out_bytes   # x tile + out tile, 2-deep
    tb = max((avail // per_row) // 8 * 8, 8)
    return int(min(_round_up(B, 8), 2048, tb))


# ----------------------------------------------------------------------------
# Wrapper: cast/pad once, tile the batch, run stats pass + fused fwd pass.
# ----------------------------------------------------------------------------
@functools.partial(jax.jit, static_argnames=("block_b", "compute_dtype", "out_dtype"))
def linear_classifier(x, w1, b1, gamma, beta, w2, b2, *, block_b=None,
                      compute_dtype=jnp.bfloat16, out_dtype=None):
    B, F = x.shape
    H = w1.shape[1]
    O = w2.shape[1]
    HP = _round_up(H, LANE)   # 100 -> 128
    OP = _round_up(O, LANE)   # out -> 128 (lane-dense stores; NOT 256: HBM-bound)
    del b1  # cancels exactly under train-mode BatchNorm (mean subtraction)

    out_dtype = x.dtype if out_dtype is None else out_dtype
    cdt = compute_dtype
    x_bytes = jnp.dtype(cdt).itemsize
    out_bytes = jnp.dtype(out_dtype).itemsize
    f32 = jnp.float32

    # ---- batch tiling -------------------------------------------------------
    if block_b is None:
        TB = _pick_batch_tile(B, F, OP, x_bytes, out_bytes, HP)
    else:
        TB = min(_round_up(block_b, 8), _round_up(B, 8))
    NTOT = -(-B // TB)                       # batch tiles
    NC = 2 if NTOT >= 2 else 1               # megacore split of the stats pass
    NT_PER = -(-NTOT // NC)
    NTOT = NC * NT_PER
    BP = NTOT * TB

    # ---- operand prep: cast streaming operands once to bf16 -----------------
    xp = x.astype(cdt)
    if BP > B:
        xp = jnp.pad(xp, ((0, BP - B), (0, 0)))   # zero rows: stats-neutral
    w1p = jnp.pad(w1, ((0, 0), (0, HP - H))).astype(cdt)
    w2p = jnp.pad(w2, ((0, HP - H), (0, OP - O))).astype(cdt)
    b2p = jnp.pad(b2.reshape(1, O).astype(f32), ((0, 0), (0, OP - O)))
    gp = jnp.pad(gamma.reshape(1, H).astype(f32), ((0, 0), (0, HP - H)))
    bp = jnp.pad(beta.reshape(1, H).astype(f32), ((0, 0), (0, HP - H)))

    row2 = lambda i: (i, 0)       # batch-tiled arrays
    const2 = lambda i: (0, 0)     # VMEM-resident weights / vectors

    # ---- Pass 1: per-core partial batch statistics --------------------------
    stats_cost = pl.CostEstimate(
        flops=2 * BP * F * HP, transcendentals=0,
        bytes_accessed=BP * F * x_bytes + F * HP * x_bytes + NC * 2 * HP * 4)
    psum, psq = pl.pallas_call(
        _stats_kernel,
        out_shape=(jax.ShapeDtypeStruct((NC, 1, HP), f32),
                   jax.ShapeDtypeStruct((NC, 1, HP), f32)),
        grid=(NC, NT_PER),
        in_specs=[pl.BlockSpec((TB, F), lambda c, i: (c * NT_PER + i, 0)),
                  pl.BlockSpec((F, HP), lambda c, i: (0, 0))],
        out_specs=(pl.BlockSpec((None, 1, HP), lambda c, i: (c, 0, 0)),
                   pl.BlockSpec((None, 1, HP), lambda c, i: (c, 0, 0))),
        compiler_params=pltpu.CompilerParams(
            dimension_semantics=("parallel", "arbitrary"),
            vmem_limit_bytes=VMEM_LIMIT),
        cost_estimate=stats_cost,
    )(xp, w1p)

    # ---- Fold BN once into scale/shift (tiny (1, HP) op, fused by XLA) ------
    sum_g = jnp.sum(psum, axis=0)                       # (1, HP)
    sq_g = jnp.sum(psq, axis=0)
    mean = sum_g / B
    var = jnp.maximum(sq_g / B - mean * mean, 0.0)      # biased var (train mode)
    scale = gp * jax.lax.rsqrt(var + EPS)
    shift = bp - mean * scale                           # padded lanes stay 0

    # ---- Pass 2: normalize + ReLU + second matmul, batch-parallel -----------
    fwd_cost = pl.CostEstimate(
        flops=2 * BP * (F * HP + HP * OP), transcendentals=0,
        bytes_accessed=(BP * F * x_bytes + F * HP * x_bytes + HP * OP * x_bytes
                        + BP * OP * out_bytes + 4 * (2 * HP + OP)))
    out = pl.pallas_call(
        _fwd_kernel,
        out_shape=jax.ShapeDtypeStruct((BP, OP), out_dtype),
        grid=(NTOT,),
        in_specs=[pl.BlockSpec((TB, F), row2),
                  pl.BlockSpec((F, HP), const2),
                  pl.BlockSpec((1, HP), const2),
                  pl.BlockSpec((1, HP), const2),
                  pl.BlockSpec((HP, OP), const2),
                  pl.BlockSpec((1, OP), const2)],
        out_specs=pl.BlockSpec((TB, OP), row2),
        compiler_params=pltpu.CompilerParams(
            dimension_semantics=("parallel",),   # shards over v7x's 2 TCs
            vmem_limit_bytes=VMEM_LIMIT),
        cost_estimate=fwd_cost,
    )(xp, w1p, scale, shift, w2p, b2p)

    return out[:B, :O]


# ----------------------------------------------------------------------------
# Params / reference
# ----------------------------------------------------------------------------
def init_params(key, in_features, hidden, out_features):
    """PyTorch-like nn.Linear init (uniform +/- 1/sqrt(fan_in)); BN gamma=1, beta=0."""
    k1, k2, k3, k4 = jax.random.split(key, 4)
    bound1 = 1.0 / jnp.sqrt(in_features)
    w1 = jax.random.uniform(k1, (in_features, hidden), jnp.float32, -bound1, bound1)
    b1 = jax.random.uniform(k2, (hidden,), jnp.float32, -bound1, bound1)
    gamma = jnp.ones((hidden,), jnp.float32)
    beta = jnp.zeros((hidden,), jnp.float32)
    bound2 = 1.0 / jnp.sqrt(hidden)
    w2 = jax.random.uniform(k3, (hidden, out_features), jnp.float32, -bound2, bound2)
    b2 = jax.random.uniform(k4, (out_features,), jnp.float32, -bound2, bound2)
    return w1, b1, gamma, beta, w2, b2


def reference(x, w1, b1, gamma, beta, w2, b2):
    h = x @ w1 + b1
    mean = jnp.mean(h, axis=0, keepdims=True)
    var = jnp.mean((h - mean) ** 2, axis=0, keepdims=True)   # biased (train mode)
    h = (h - mean) / jnp.sqrt(var + EPS) * gamma + beta
    h = jnp.maximum(h, 0.0)
    return h @ w2 + b2


if __name__ == "__main__":
    # Small shapes; B=50 with block_b=16 exercises the 2-way parallel stats
    # split (grid (2, 2)), the batch grid in pass 2 (4 tiles) and the
    # zero-padded batch rows.
    B, in_features, hidden, out_features = 50, 32, 100, 10

    key = jax.random.PRNGKey(0)
    kx, kp = jax.random.split(key)
    x = jax.random.normal(kx, (B, in_features), jnp.float32)
    params = init_params(kp, in_features, hidden, out_features)

    out = linear_classifier(x, *params, block_b=16)
    out = jax.block_until_ready(out)

    ref = reference(x, *params)
    assert out.shape == (B, out_features)
    # bf16 streaming operands => loosened tolerance vs the f32 reference.
    max_err = float(jnp.max(jnp.abs(out - ref)))
    assert jnp.allclose(out, ref, atol=5e-2, rtol=5e-2), f"mismatch: {max_err}"
    print("KERNEL_OK")
</pallas_src>

<mosaic_0001>
module attributes {stable_mosaic.version = 11 : i64} {
  func.func @_stats_kernel(%arg0: i32, %arg1: i32, %arg2: memref<16x32xbf16, #tpu.memory_space<vmem>>, %arg3: memref<32x128xbf16, #tpu.memory_space<vmem>>, %arg4: memref<1x1x128xf32, #tpu.memory_space<vmem>>, %arg5: memref<1x1x128xf32, #tpu.memory_space<vmem>>) attributes {dimension_semantics = [#tpu.dimension_semantics<parallel>, #tpu.dimension_semantics<arbitrary>], iteration_bounds = array<i64: 2, 2>, scalar_prefetch = 0 : i64, scratch_operands = 0 : i64, tpu.core_type = #tpu.core_type<tc>, window_params = [{transform_indices = @transform_0, window_bounds = array<i64: 16, 32>}, {pipeline_mode = #tpu.pipeline_mode<synchronous>, transform_indices = @transform_1, window_bounds = array<i64: 32, 128>}, {transform_indices = @transform_2, window_bounds = array<i64: 1, 1, 128>}, {transform_indices = @transform_3, window_bounds = array<i64: 1, 1, 128>}]} {
    %c0_i32 = arith.constant 0 : i32
    %0 = arith.cmpi eq, %arg1, %c0_i32 : i32
    %1 = arith.extui %0 : i1 to i32
    %c0_i32_0 = arith.constant 0 : i32
    %2 = arith.cmpi ne, %1, %c0_i32_0 : i32
    scf.if %2 {
      %cst_18 = arith.constant 0.000000e+00 : f32
      %23 = vector.broadcast %cst_18 : f32 to vector<1x128xf32>
      %c0_19 = arith.constant 0 : index
      %c0_20 = arith.constant 0 : index
      %c0_21 = arith.constant 0 : index
      %24 = vector.load %arg4[%c0_19, %c0_20, %c0_21] : memref<1x1x128xf32, #tpu.memory_space<vmem>>, vector<1x1x128xf32>
      %25 = vector.shape_cast %24 : vector<1x1x128xf32> to vector<1x128xf32>
      %26 = vector.shape_cast %23 : vector<1x128xf32> to vector<1x1x128xf32>
      tpu.vector_store %arg4[%c0_19, %c0_20, %c0_21], %26 {strides = array<i32>} : memref<1x1x128xf32, #tpu.memory_space<vmem>>, vector<1x1x128xf32>,
      %cst_22 = arith.constant 0.000000e+00 : f32
      %27 = vector.broadcast %cst_22 : f32 to vector<1x128xf32>
      %c0_23 = arith.constant 0 : index
      %c0_24 = arith.constant 0 : index
      %c0_25 = arith.constant 0 : index
      %28 = vector.load %arg5[%c0_23, %c0_24, %c0_25] : memref<1x1x128xf32, #tpu.memory_space<vmem>>, vector<1x1x128xf32>
      %29 = vector.shape_cast %28 : vector<1x1x128xf32> to vector<1x128xf32>
      %30 = vector.shape_cast %27 : vector<1x128xf32> to vector<1x1x128xf32>
      tpu.vector_store %arg5[%c0_23, %c0_24, %c0_25], %30 {strides = array<i32>} : memref<1x1x128xf32, #tpu.memory_space<vmem>>, vector<1x1x128xf32>,
    } else {
    }
    %c0 = arith.constant 0 : index
    %c0_1 = arith.constant 0 : index
    %3 = vector.load %arg2[%c0, %c0_1] : memref<16x32xbf16, #tpu.memory_space<vmem>>, vector<16x32xbf16>
    %c0_2 = arith.constant 0 : index
    %c0_3 = arith.constant 0 : index
    %4 = vector.load %arg3[%c0_2, %c0_3] : memref<32x128xbf16, #tpu.memory_space<vmem>>, vector<32x128xbf16>
    %cst = arith.constant dense<0.000000e+00> : vector<16x128xf32>
    %5 = tpu.matmul %3, %4, %cst {dimension_numbers = #tpu.dot_dimension_numbers<[1], [0], [0], [1], [0, 0, 1, 1], [], []>} : vector<16x32xbf16>, vector<32x128xbf16>, vector<16x128xf32> -> vector<16x128xf32>
    %c0_4 = arith.constant 0 : index
    %c0_5 = arith.constant 0 : index
    %c0_6 = arith.constant 0 : index
    %6 = vector.load %arg4[%c0_4, %c0_5, %c0_6] : memref<1x1x128xf32, #tpu.memory_space<vmem>>, vector<1x1x128xf32>
    %7 = vector.shape_cast %6 : vector<1x1x128xf32> to vector<1x128xf32>
    %cst_7 = arith.constant dense<0.000000e+00> : vector<128xf32>
    %8 = vector.multi_reduction <add>, %5, %cst_7 [0] : vector<16x128xf32> to vector<128xf32>
    %9 = vector.shape_cast %8 : vector<128xf32> to vector<1x128xf32>
    %10 = arith.addf %7, %9 : vector<1x128xf32>
    %c0_8 = arith.constant 0 : index
    %c0_9 = arith.constant 0 : index
    %c0_10 = arith.constant 0 : index
    %11 = vector.load %arg4[%c0_8, %c0_9, %c0_10] : memref<1x1x128xf32, #tpu.memory_space<vmem>>, vector<1x1x128xf32>
    %12 = vector.shape_cast %11 : vector<1x1x128xf32> to vector<1x128xf32>
    %13 = vector.shape_cast %10 : vector<1x128xf32> to vector<1x1x128xf32>
    tpu.vector_store %arg4[%c0_8, %c0_9, %c0_10], %13 {strides = array<i32>} : memref<1x1x128xf32, #tpu.memory_space<vmem>>, vector<1x1x128xf32>,
    %c0_11 = arith.constant 0 : index
    %c0_12 = arith.constant 0 : index
    %c0_13 = arith.constant 0 : index
    %14 = vector.load %arg5[%c0_11, %c0_12, %c0_13] : memref<1x1x128xf32, #tpu.memory_space<vmem>>, vector<1x1x128xf32>
    %15 = vector.shape_cast %14 : vector<1x1x128xf32> to vector<1x128xf32>
    %16 = arith.mulf %5, %5 : vector<16x128xf32>
    %cst_14 = arith.constant dense<0.000000e+00> : vector<128xf32>
    %17 = vector.multi_reduction <add>, %16, %cst_14 [0] : vector<16x128xf32> to vector<128xf32>
    %18 = vector.shape_cast %17 : vector<128xf32> to vector<1x128xf32>
    %19 = arith.addf %15, %18 : vector<1x128xf32>
    %c0_15 = arith.constant 0 : index
    %c0_16 = arith.constant 0 : index
    %c0_17 = arith.constant 0 : index
    %20 = vector.load %arg5[%c0_15, %c0_16, %c0_17] : memref<1x1x128xf32, #tpu.memory_space<vmem>>, vector<1x1x128xf32>
    %21 = vector.shape_cast %20 : vector<1x1x128xf32> to vector<1x128xf32>
    %22 = vector.shape_cast %19 : vector<1x128xf32> to vector<1x1x128xf32>
    tpu.vector_store %arg5[%c0_15, %c0_16, %c0_17], %22 {strides = array<i32>} : memref<1x1x128xf32, #tpu.memory_space<vmem>>, vector<1x1x128xf32>,
    return
  }
  func.func @transform_0(%arg0: i32, %arg1: i32) -> (i32, i32) {
    %c2_i32 = arith.constant 2 : i32
    %0 = arith.muli %arg0, %c2_i32 : i32
    %1 = arith.addi %0, %arg1 : i32
    %c0_i32 = arith.constant 0 : i32
    %c0_i32_0 = arith.constant 0 : i32
    return %1, %c0_i32 : i32, i32
  }
  func.func @transform_1(%arg0: i32, %arg1: i32) -> (i32, i32) {
    %c0_i32 = arith.constant 0 : i32
    %c0_i32_0 = arith.constant 0 : i32
    %c0_i32_1 = arith.constant 0 : i32
    return %c0_i32, %c0_i32_0 : i32, i32
  }
  func.func @transform_2(%arg0: i32, %arg1: i32) -> (i32, i32, i32) {
    %c0_i32 = arith.constant 0 : i32
    %c0_i32_0 = arith.constant 0 : i32
    %c0_i32_1 = arith.constant 0 : i32
    return %arg0, %c0_i32, %c0_i32_0 : i32, i32, i32
  }
  func.func @transform_3(%arg0: i32, %arg1: i32) -> (i32, i32, i32) {
    %c0_i32 = arith.constant 0 : i32
    %c0_i32_0 = arith.constant 0 : i32
    %c0_i32_1 = arith.constant 0 : i32
    return %arg0, %c0_i32, %c0_i32_0 : i32, i32, i32
  }
}

module attributes {stable_mosaic.version = 11 : i64} {
  func.func @_fwd_kernel(%arg0: i32, %arg1: memref<16x32xbf16, #tpu.memory_space<vmem>>, %arg2: memref<32x128xbf16, #tpu.memory_space<vmem>>, %arg3: memref<1x128xf32, #tpu.memory_space<vmem>>, %arg4: memref<1x128xf32, #tpu.memory_space<vmem>>, %arg5: memref<128x128xbf16, #tpu.memory_space<vmem>>, %arg6: memref<1x128xf32, #tpu.memory_space<vmem>>, %arg7: memref<16x128xf32, #tpu.memory_space<vmem>>) attributes {dimension_semantics = [#tpu.dimension_semantics<parallel>], iteration_bounds = array<i64: 4>, scalar_prefetch = 0 : i64, scratch_operands = 0 : i64, tpu.core_type = #tpu.core_type<tc>, window_params = [{transform_indices = @transform_0, window_bounds = array<i64: 16, 32>}, {pipeline_mode = #tpu.pipeline_mode<synchronous>, transform_indices = @transform_1, window_bounds = array<i64: 32, 128>}, {pipeline_mode = #tpu.pipeline_mode<synchronous>, transform_indices = @transform_2, window_bounds = array<i64: 1, 128>}, {pipeline_mode = #tpu.pipeline_mode<synchronous>, transform_indices = @transform_3, window_bounds = array<i64: 1, 128>}, {pipeline_mode = #tpu.pipeline_mode<synchronous>, transform_indices = @transform_4, window_bounds = array<i64: 128, 128>}, {pipeline_mode = #tpu.pipeline_mode<synchronous>, transform_indices = @transform_5, window_bounds = array<i64: 1, 128>}, {transform_indices = @transform_6, window_bounds = array<i64: 16, 128>}]} {
    %c0 = arith.constant 0 : index
    %c0_0 = arith.constant 0 : index
    %0 = vector.load %arg1[%c0, %c0_0] : memref<16x32xbf16, #tpu.memory_space<vmem>>, vector<16x32xbf16>
    %c0_1 = arith.constant 0 : index
    %c0_2 = arith.constant 0 : index
    %1 = vector.load %arg2[%c0_1, %c0_2] : memref<32x128xbf16, #tpu.memory_space<vmem>>, vector<32x128xbf16>
    %cst = arith.constant dense<0.000000e+00> : vector<16x128xf32>
    %2 = tpu.matmul %0, %1, %cst {dimension_numbers = #tpu.dot_dimension_numbers<[1], [0], [0], [1], [0, 0, 1, 1], [], []>} : vector<16x32xbf16>, vector<32x128xbf16>, vector<16x128xf32> -> vector<16x128xf32>
    %c0_3 = arith.constant 0 : index
    %c0_4 = arith.constant 0 : index
    %3 = vector.load %arg3[%c0_3, %c0_4] : memref<1x128xf32, #tpu.memory_space<vmem>>, vector<1x128xf32>
    %4 = vector.broadcast %3 : vector<1x128xf32> to vector<16x128xf32>
    %5 = arith.mulf %2, %4 : vector<16x128xf32>
    %c0_5 = arith.constant 0 : index
    %c0_6 = arith.constant 0 : index
    %6 = vector.load %arg4[%c0_5, %c0_6] : memref<1x128xf32, #tpu.memory_space<vmem>>, vector<1x128xf32>
    %7 = vector.broadcast %6 : vector<1x128xf32> to vector<16x128xf32>
    %8 = arith.addf %5, %7 : vector<16x128xf32>
    %cst_7 = arith.constant 0.000000e+00 : f32
    %9 = vector.broadcast %cst_7 : f32 to vector<16x128xf32>
    %10 = arith.maximumf %8, %9 : vector<16x128xf32>
    %11 = arith.truncf %10 : vector<16x128xf32> to vector<16x128xbf16>
    %c0_8 = arith.constant 0 : index
    %c0_9 = arith.constant 0 : index
    %12 = vector.load %arg5[%c0_8, %c0_9] : memref<128x128xbf16, #tpu.memory_space<vmem>>, vector<128x128xbf16>
    %cst_10 = arith.constant dense<0.000000e+00> : vector<16x128xf32>
    %13 = tpu.matmul %11, %12, %cst_10 {dimension_numbers = #tpu.dot_dimension_numbers<[1], [0], [0], [1], [0, 0, 1, 1], [], []>} : vector<16x128xbf16>, vector<128x128xbf16>, vector<16x128xf32> -> vector<16x128xf32>
    %c0_11 = arith.constant 0 : index
    %c0_12 = arith.constant 0 : index
    %14 = vector.load %arg6[%c0_11, %c0_12] : memref<1x128xf32, #tpu.memory_space<vmem>>, vector<1x128xf32>
    %15 = vector.broadcast %14 : vector<1x128xf32> to vector<16x128xf32>
    %16 = arith.addf %13, %15 : vector<16x128xf32>
    %c0_13 = arith.constant 0 : index
    %c0_14 = arith.constant 0 : index
    %17 = vector.load %arg7[%c0_13, %c0_14] : memref<16x128xf32, #tpu.memory_space<vmem>>, vector<16x128xf32>
    tpu.vector_store %arg7[%c0_13, %c0_14], %16 {strides = array<i32>} : memref<16x128xf32, #tpu.memory_space<vmem>>, vector<16x128xf32>,
    return
  }
  func.func @transform_0(%arg0: i32) -> (i32, i32) {
    %c0_i32 = arith.constant 0 : i32
    %c0_i32_0 = arith.constant 0 : i32
    return %arg0, %c0_i32 : i32, i32
  }
  func.func @transform_1(%arg0: i32) -> (i32, i32) {
    %c0_i32 = arith.constant 0 : i32
    %c0_i32_0 = arith.constant 0 : i32
    %c0_i32_1 = arith.constant 0 : i32
    return %c0_i32, %c0_i32_0 : i32, i32
  }
  func.func @transform_2(%arg0: i32) -> (i32, i32) {
    %c0_i32 = arith.constant 0 : i32
    %c0_i32_0 = arith.constant 0 : i32
    %c0_i32_1 = arith.constant 0 : i32
    return %c0_i32, %c0_i32_0 : i32, i32
  }
  func.func @transform_3(%arg0: i32) -> (i32, i32) {
    %c0_i32 = arith.constant 0 : i32
    %c0_i32_0 = arith.constant 0 : i32
    %c0_i32_1 = arith.constant 0 : i32
    return %c0_i32, %c0_i32_0 : i32, i32
  }
  func.func @transform_4(%arg0: i32) -> (i32, i32) {
    %c0_i32 = arith.constant 0 : i32
    %c0_i32_0 = arith.constant 0 : i32
    %c0_i32_1 = arith.constant 0 : i32
    return %c0_i32, %c0_i32_0 : i32, i32
  }
  func.func @transform_5(%arg0: i32) -> (i32, i32) {
    %c0_i32 = arith.constant 0 : i32
    %c0_i32_0 = arith.constant 0 : i32
    %c0_i32_1 = arith.constant 0 : i32
    return %c0_i32, %c0_i32_0 : i32, i32
  }
  func.func @transform_6(%arg0: i32) -> (i32, i32) {
    %c0_i32 = arith.constant 0 : i32
    %c0_i32_0 = arith.constant 0 : i32
    return %arg0, %c0_i32 : i32, i32
  }
}

</mosaic_0001>

<bundles_post_ra>
// kernel: linear_classifier.2
= control target key start
LH: loop header
LB: loop body
LE: loop exit
PB: predicated region body
PF: predicated region fallthrough
CT: control target
= control target key end

     0   :  { %s521_s12 = smov 0   ;;  %s523_s13 = smov 0   ;;  %s591_s0 = inlined_call_operand.vmem [shape: bf16[64,32], index: 0, kind: input, shape index: {}]   ;;  %s592_s1 = inlined_call_operand.vmem [shape: bf16[32,128], index: 1, kind: input, shape index: {}]   ;;  %s593_s2 = inlined_call_operand.vmem [shape: f32[2,1,128], index: 2, kind: output, shape index: {0}]   ;;  %s594_s3 = inlined_call_operand.vmem [shape: f32[2,1,128], index: 3, kind: output, shape index: {1}]  }
   0x1   :  { %s525_s14 = smov 0   ;;  %s527_s15 = smov 0  }
   0x2   :  { %s529_s16 = smov 0  }
   0x3 LB: > { %s23_s17 = sadd.s32 1, %s488_s14  ;;  %s26_s18 = sadd.s32 1, %s492_s15  ;;  %s496_s16 = sphi %s529_s16, %s14_s16   ;;  %s492_s15 = sphi %s527_s15, %s598_s15   ;;  %s488_s14 = sphi %s525_s14, %s597_s14   ;;  %s484_s13 = sphi %s523_s13, %s596_s13   ;;  %s480_s12 = sphi %s521_s12, %s595_s12  }
   0x4   : > { %p24_p0 = scmp.ge.s32.totalorder %s23_s17, 2  ;;  %p390_p1 = scmp.ge.s32.totalorder %s496_s16, 1 }
   0x5   : > { %p161_p2 = scmp.lt.s32.totalorder %s496_s16, 5 }
   0x6   : > { %s600_s17 = smov (%p24_p0, %s23_s17), 0  ;;  %s602_s18 = smov (!%p24_p0, %s26_s18), %s492_s15 }
   0x7   : > { %p162_p3 = pnand %p390_p1, %p161_p2  ;;  %p28_p4 = scmp.ge.s32.totalorder %s602_s18, 2 }
   0x8   : > { %s391_s19 = sshll.u32 (!%p162_p3), %s484_s13, 1  ;;  %p198_p5 = scmp.lt.s32.totalorder (!%p162_p3), %s484_s13, 1 }
   0x9   : > { %s604_s18 = smov (%p28_p4, %s602_s18), 0  ;;  %165 = sbr.rel (%p162_p3) target bundleno = 267 (0x10b), region = 28 }
   0xa   : > { %s189_s20 = sadd.s32 (!%p162_p3), %s480_s12, %s391_s19  ;;  %p394_p7 = scmp.ne.s32.totalorder (!%p162_p3), %s480_s12, 0 }
   0xb   : > { %s392_s21 = sshll.u32 (!%p162_p3), %s189_s20, 1 }
   0xc   : > { %p191_p6 = scmp.lt.s32.totalorder (!%p162_p3), %s392_s21, 7 }
  0x10   : > { %s606_s13 = smov (!%p198_p5, %s484_s13), 1  ;;  %s608_s21 = smov (!%p191_p6, %s392_s21), 7 }
  0x11   : > { %s554_s24 = scalar_lea.vmem %s593_s2, %s606_s13  ;;  %s559_s27 = scalar_lea.vmem %s594_s3, %s606_s13  ;;  %v498_v0 = vmov (!%p394_p7), 0.0  }
  0x12   : > { %s393_s28 = sshll.u32 %s608_s21, 2  ;;  %208 = sbr.rel (%p394_p7) target bundleno = 25 (0x19), region = 32  ;;  %209 = vst [vmem:[%s554_s24] sm:$0x1] (!%p394_p7), %v498_v0  ;;  %210 = vst [vmem:[%s559_s27] sm:$0x1] (!%p394_p7), %v498_v0 }
  0x13   : > { %s194_s4 = scalar_lea.vmem %s591_s0, %s393_s28 }
  0x19 PF: > { %v455_v1 = vld [vmem:[%s592_s1] sm:$0xff]   ;;  %v499_v2 = vmov 0.0   ;;  %v456_v3 = vld [vmem:[%s592_s1 + $0x8] sm:$0xff]   ;;  %vm500_vm0 = vmmov 0   ;;  %vm234_vm1 = vcmask 261120  }
  0x1a   : > { %404 = vmatprep.subr.bf16.mxu0 %v499_v2  ;;  %408 = vmatprep.mubr.msk.bf16.mxu0 %vm500_vm0, %v499_v2  ;;  %v457_v4 = vld [vmem:[%s194_s4] sm:$0xff]  }
  0x1b   : > { %405 = vmatpush3.bf16.msra.mxu0 %v455_v1  ;;  %v279_v22 = vld [vmem:[%s554_s24] sm:$0x1] }
  0x1c   : > { %406 = vmatprep.subr.bf16.mxu0 %v499_v2  ;;  %v289_v25 = vld [vmem:[%s559_s27] sm:$0x1] }
  0x1f   : > { %407 = vmatpush3.bf16.msra.mxu0 %v456_v3 }
  0x22   : > { %409 = vmatmul.mubr.msk.bf16.vlgmr.msra.gmra.mrb[0].mxu0 %vm234_vm1, %v457_v4 }
  0xf5   : > { %v272_v5 = vpop.f32.mrb[0].mxu0 }
  0xf6   : > { %v410_v6 = vpop.f32.mrb[1].mxu0  ;;  %v290_v8 = vmul.f32 %v272_v5, %v272_v5 }
  0xf7   : > { %v275_v7 = vpop.f32.mrb[2].mxu0 }
  0xf8   : > { %v280_v9 = vadd.f32 %v275_v7, %v272_v5  ;;  %v291_v10 = vmul.f32 %v275_v7, %v275_v7  ;;  %v411_v11 = vpop.f32.mrb[3].mxu0 }
  0xfa   : > { %v281_v12 = vrot.slane %v280_v9, 4  ;;  %v292_v13 = vadd.f32 %v291_v10, %v290_v8 }
  0xfc   : > { %v282_v14 = vadd.f32 %v281_v12, %v280_v9  ;;  %v293_v15 = vrot.slane %v292_v13, 4 }
  0xfe   : > { %v283_v16 = vrot.slane %v282_v14, 2  ;;  %v294_v17 = vadd.f32 %v293_v15, %v292_v13 }
 0x100   : > { %v284_v18 = vadd.f32 %v283_v16, %v282_v14  ;;  %v295_v19 = vrot.slane %v294_v17, 2 }
 0x102   : > { %v285_v20 = vrot.slane %v284_v18, 1  ;;  %v296_v21 = vadd.f32 %v295_v19, %v294_v17 }
 0x104   : > { %v286_v23 = vadd.f32 %v285_v20, %v284_v18  ;;  %v297_v24 = vrot.slane %v296_v21, 1 }
 0x106   : > { %v287_v26 = vadd.f32 %v286_v23, %v279_v22  ;;  %v298_v27 = vadd.f32 %v297_v24, %v296_v21 }
 0x108   : > { %288 = vst [vmem:[%s554_s24] sm:$0x1] %v287_v26  ;;  %v299_v28 = vadd.f32 %v298_v27, %v289_v25 }
 0x10a   : > { %300 = vst [vmem:[%s559_s27] sm:$0x1] %v299_v28 }
 0x10b PF: > { %s14_s16 = sadd.s32 1, %s496_s16   ;;  %s595_s12 = smov %s488_s14 }
 0x10c   : > { %p11_p8 = scmp.ge.s32.totalorder %s14_s16, 6   ;;  %s596_s13 = smov %s492_s15 }
 0x10d   : > { %s597_s14 = smov %s600_s17  ;;  %s598_s15 = smov %s604_s18 }
 0x10e   :  { %13 = sbr.rel (!%p11_p8) target bundleno = 3 (0x3), region = 74 }

// kernel: linear_classifier.3
= control target key start
LH: loop header
LB: loop body
LE: loop exit
PB: predicated region body
PF: predicated region fallthrough
CT: control target
= control target key end

     0   :  { %s647_s21 = smov 0   ;;  %s707_s0 = inlined_call_operand.vmem [shape: bf16[64,32], index: 0, kind: input, shape index: {}]   ;;  %s708_s1 = inlined_call_operand.vmem [shape: bf16[32,128], index: 1, kind: input, shape index: {}]   ;;  %s709_s2 = inlined_call_operand.vmem [shape: f32[1,128], index: 2, kind: input, shape index: {}]   ;;  %s710_s3 = inlined_call_operand.vmem [shape: f32[1,128], index: 3, kind: input, shape index: {}]   ;;  %s711_s4 = inlined_call_operand.vmem [shape: bf16[128,128], index: 4, kind: input, shape index: {}]   ;;  %s712_s5 = inlined_call_operand.vmem [shape: f32[1,128], index: 5, kind: input, shape index: {}]   ;;  %s713_s6 = inlined_call_operand.vmem [shape: f32[64,128], index: 6, kind: output, shape index: {}]  }
   0x1 LB: > { %s515_s22 = sadd.s32 4294967295, %s608_s21   ;;  %p519_p0 = scmp.ge.s32.totalorder %s608_s21, 1  ;;  %s608_s21 = sphi %s647_s21, %s16_s21  }
   0x2   : > { %p213_p1 = scmp.lt.s32.totalorder %s608_s21, 5 }
   0x4   : > { %p214_p2 = pnand %p519_p0, %p213_p1 }
   0x5   : > { %v591_v0 = vld [vmem:[%s708_s1] sm:$0xff] (!%p214_p2)   ;;  %v610_v1 = vmov (!%p214_p2), 0.0   ;;  %v592_v2 = vld [vmem:[%s708_s1 + $0x8] sm:$0xff] (!%p214_p2)   ;;  %vm611_vm0 = vmmov (!%p214_p2), 0   ;;  %s520_s27 = sshll.u32 (!%p214_p2), %s515_s22, 1  ;;  %vm279_vm1 = vcmask (!%p214_p2), 261120  }
   0x6   : > { %217 = sbr.rel (%p214_p2) target bundleno = 456 (0x1c8), region = 44  ;;  %553 = vmatprep.subr.bf16.mxu0 (!%p214_p2), %v610_v1  ;;  %561 = vmatprep.subr.bf16.mxu1 (!%p214_p2), %v610_v1  ;;  %p244_p3 = scmp.lt.s32.totalorder (!%p214_p2), %s520_s27, 7  ;;  %v594_v3 = vld [vmem:[%s711_s4] sm:$0xff] (!%p214_p2)   ;;  %v595_v4 = vld [vmem:[%s711_s4 + $0x8] sm:$0xff] (!%p214_p2)   ;;  %v596_v5 = vld [vmem:[%s711_s4 + $0x10] sm:$0xff] (!%p214_p2)  }
   0x7   : > { %554 = vmatpush3.bf16.msra.mxu0 (!%p214_p2), %v591_v0  ;;  %557 = vmatprep.mubr.msk.bf16.mxu0 (!%p214_p2), %vm611_vm0, %v610_v1  ;;  %v597_v7 = vld [vmem:[%s711_s4 + $0x18] sm:$0xff] (!%p214_p2)   ;;  %v598_v8 = vld [vmem:[%s711_s4 + $0x20] sm:$0xff] (!%p214_p2)   ;;  %v599_v9 = vld [vmem:[%s711_s4 + $0x28] sm:$0xff] (!%p214_p2)  }
   0x8   : > { %555 = vmatprep.subr.bf16.mxu0 (!%p214_p2), %v610_v1  ;;  %577 = vmatprep.mubr.msk.bf16.mxu1 (!%p214_p2), %vm611_vm0, %v610_v1  ;;  %v600_v10 = vld [vmem:[%s711_s4 + $0x30] sm:$0xff] (!%p214_p2)   ;;  %v601_v11 = vld [vmem:[%s711_s4 + $0x38] sm:$0xff] (!%p214_p2)   ;;  %v528_v12 = vld [vmem:[%s709_s2] ss:$0 sm:$0xff] (!%p214_p2) }
   0x9   : > { %562 = vmatpush3.bf16.msra.mxu1 (!%p214_p2), %v594_v3  ;;  %v529_v14 = vld [vmem:[%s710_s3] ss:$0 sm:$0xff] (!%p214_p2) }
   0xa   : > { %563 = vmatprep.subr.bf16.mxu1 (!%p214_p2), %v610_v1  ;;  %v530_v25 = vld [vmem:[%s712_s5] ss:$0 sm:$0xff] (!%p214_p2) }
   0xb   : > { %556 = vmatpush3.bf16.msra.mxu0 (!%p214_p2), %v592_v2 }
   0xd   : > { %s715_s27 = smov (!%p244_p3, %s520_s27), 7  ;;  %564 = vmatpush3.bf16.msra.mxu1 %v595_v4 }
   0xe   : > { %s521_s8 = sshll.u32 %s715_s27, 2  ;;  %565 = vmatprep.subr.bf16.mxu1 %v610_v1  ;;  %s523_s30 = sshll.u32 %s715_s27, 3 }
   0xf   : > { %s247_s13 = scalar_lea.vmem %s707_s0, %s521_s8  ;;  %s253_s11 = scalar_lea.vmem %s713_s6, %s523_s30 }
  0x10   : > { %v593_v6 = vld [vmem:[%s247_s13] sm:$0xff]  }
  0x11   : > { %558 = vmatmul.mubr.msk.bf16.vlgmr.msra.gmra.mrb[0].mxu0 %vm279_vm1, %v593_v6  ;;  %566 = vmatpush3.bf16.msra.mxu1 %v596_v5 }
  0x12   : > { %567 = vmatprep.subr.bf16.mxu1 %v610_v1 }
  0x15   : > { %568 = vmatpush3.bf16.msra.mxu1 %v597_v7 }
  0x16   : > { %569 = vmatprep.subr.bf16.mxu1 %v610_v1 }
  0x19   : > { %570 = vmatpush3.bf16.msra.mxu1 %v598_v8 }
  0x1a   : > { %571 = vmatprep.subr.bf16.mxu1 %v610_v1 }
  0x1d   : > { %572 = vmatpush3.bf16.msra.mxu1 %v599_v9 }
  0x1e   : > { %573 = vmatprep.subr.bf16.mxu1 %v610_v1 }
  0x21   : > { %574 = vmatpush3.bf16.msra.mxu1 %v600_v10 }
  0x22   : > { %575 = vmatprep.subr.bf16.mxu1 %v610_v1 }
  0x25   : > { %576 = vmatpush3.bf16.msra.mxu1 %v601_v11 }
  0xe4   : > { %v317_v13 = vpop.f32.mrb[0].mxu0 }
  0xe5   : > { %v331_v15 = vmul.f32 %v528_v12, %v317_v13  ;;  %v559_v16 = vpop.f32.mrb[1].mxu0 }
  0xe6   : > { %v320_v17 = vpop.f32.mrb[2].mxu0 }
  0xe7   : > { %v340_v18 = vadd.f32 %v529_v14, %v331_v15  ;;  %v332_v19 = vmul.f32 %v528_v12, %v320_v17  ;;  %v560_v20 = vpop.f32.mrb[3].mxu0 }
  0xe9   : > { %v341_v21 = vadd.f32 %v529_v14, %v332_v19  ;;  %v342_v22 = vmax.f32 %v340_v18, 0.0 }
  0xeb   : > { %v343_v23 = vmax.f32 %v341_v21, 0.0 }
  0xed   : > { %v344_v24 = vpack.c.bf16 %v343_v23, %v342_v22 }
  0xef   : > { %578 = vmatmul.mubr.bf16.vlgmr.msra.gmra.mrb[0].mxu1 %v344_v24 }
 0x1c2   : > { %v450_v26 = vpop.f32.mrb[0].mxu1 }
 0x1c3   : > { %v451_v27 = vadd.f32 %v530_v25, %v450_v26  ;;  %v579_v28 = vpop.f32.mrb[1].mxu1 }
 0x1c4   : > { %v453_v29 = vpop.f32.mrb[2].mxu1 }
 0x1c5   : > { %457 = vst [vmem:[%s253_s11] sm:$0xff] %v451_v27  ;;  %v454_v30 = vadd.f32 %v530_v25, %v453_v29  ;;  %v580_v31 = vpop.f32.mrb[3].mxu1 }
 0x1c7   : > { %458 = vst [vmem:[%s253_s11 + $0x8] sm:$0xff] %v454_v30 }
 0x1c8 PF: > { %s16_s21 = sadd.s32 1, %s608_s21  }
 0x1c9   : > { %p13_p4 = scmp.ge.s32.totalorder %s16_s21, 6  }
 0x1cb   :  { %15 = sbr.rel (!%p13_p4) target bundleno = 1 (0x1), region = 74 }

</bundles_post_ra>
